<compile_context>
chip_gen: v6e
topology: v6e:2x2x1
jax: 0.10.0
libtpu: 0.0.40
codegen_flags: <defaults>
</compile_context>

<pallas_src>
import functools

import jax
import jax.numpy as jnp
from jax.experimental import pallas as pl
from jax.experimental.pallas import tpu as pltpu


_TOKEN_TILE = 256                 # token-dim tile for the fused stage kernels
_VMEM_LIMIT = 32 * 1024 * 1024    # modest scoped-VMEM cap; safe on v5e/v6e/v7x


def _round_up(x, m):
    return (x + m - 1) // m * m


def _pad2(a, rp, cp):
    r, c = a.shape
    if r == rp and c == cp:
        return a
    return jnp.pad(a, ((0, rp - r), (0, cp - c)))


def _token_tile(t):
    """Pick a token tile (multiple of 8) and the padded token count."""
    tt = min(_TOKEN_TILE, _round_up(t, 8))
    return tt, _round_up(t, tt)


# ----------------------------------------------------------------------------
# Pallas kernel 1: generic tiled linear  y = act(x @ w + b)
#   grid = (M/tm, N/tn, K/tk); f32 accumulator in VMEM scratch; bias + act
#   applied once in the k == last finalize branch.  Inputs are pre-padded
#   bf16 (lane-dense); output is bf16 (or requested dtype).
# ----------------------------------------------------------------------------
def _linear_kernel(x_ref, w_ref, b_ref, o_ref, acc_ref, *, act):
    k = pl.program_id(2)

    @pl.when(k == 0)
    def _():
        acc_ref[...] = jnp.zeros_like(acc_ref)

    acc_ref[...] += jnp.dot(x_ref[...], w_ref[...],
                            preferred_element_type=jnp.float32)

    @pl.when(k == pl.num_programs(2) - 1)
    def _():
        y = acc_ref[...] + b_ref[...]          # bias in f32, once
        if act == "gelu":
            # TODO(synk): PyTorch nn.GELU defaults to the exact erf form; the
            # tanh approximation is used here (known-good TPU lowering).
            y = jax.nn.gelu(y, approximate=True)
        o_ref[...] = y.astype(o_ref.dtype)


def pallas_linear(x, w, b, act="none", *, out_dtype=jnp.bfloat16,
                  tm=512, tn=256, tk=512):
    """y = act(x @ w + b). x:[M,K] bf16 (K lane-padded), w:[K,N] bf16, b:[1,N] f32."""
    M, K = x.shape
    K2, N = w.shape
    assert K == K2 and b.shape == (1, N)
    assert K % 128 == 0 and N % 128 == 0, "operands must be pre-lane-padded"

    tm_e = min(tm, _round_up(M, 8))
    tn_e = min(tn, N)
    tk_e = min(tk, K)
    Mp, Np, Kp = _round_up(M, tm_e), _round_up(N, tn_e), _round_up(K, tk_e)

    # No-ops in the common (already aligned) path.
    xp = x if (Mp == M and Kp == K) else jnp.pad(x, ((0, Mp - M), (0, Kp - K)))
    wp = w if (Kp == K and Np == N) else jnp.pad(w, ((0, Kp - K), (0, Np - N)))
    bp = b if Np == N else jnp.pad(b, ((0, 0), (0, Np - N)))

    grid = (Mp // tm_e, Np // tn_e, Kp // tk_e)
    cost = pl.CostEstimate(
        flops=2 * Mp * Np * Kp,
        transcendentals=Mp * Np if act == "gelu" else 0,
        bytes_accessed=Mp * Kp * 2 + Kp * Np * 2 + Np * 4 + Mp * Np * 2,
    )

    out = pl.pallas_call(
        functools.partial(_linear_kernel, act=act),
        out_shape=jax.ShapeDtypeStruct((Mp, Np), out_dtype),
        grid_spec=pltpu.PrefetchScalarGridSpec(
            num_scalar_prefetch=0,
            grid=grid,
            in_specs=[
                pl.BlockSpec((tm_e, tk_e), lambda i, j, k: (i, k)),
                pl.BlockSpec((tk_e, tn_e), lambda i, j, k: (k, j)),
                pl.BlockSpec((1, tn_e), lambda i, j, k: (0, j)),
            ],
            out_specs=pl.BlockSpec((tm_e, tn_e), lambda i, j, k: (i, j)),
            scratch_shapes=[pltpu.VMEM((tm_e, tn_e), jnp.float32)],
        ),
        compiler_params=pltpu.CompilerParams(
            dimension_semantics=("parallel", "parallel", "arbitrary"),
            vmem_limit_bytes=_VMEM_LIMIT,
        ),
        cost_estimate=cost,
    )(xp, wp, bp)
    if Mp != M or Np != N:
        out = out[:M, :N]
    return out


# ----------------------------------------------------------------------------
# Pallas kernel 2: fused ENCODER stage
#   tok = patches @ Wp + bp + pos ; out = tok + MLP(tok)   (GELU MLP, residual)
# All weights resident; the [tt, H] hidden and the token activations never
# touch HBM.  Grid = (B, tokens/tt), both axes parallel.
# ----------------------------------------------------------------------------
def _enc_stage_kernel(patches_ref, pw_ref, pb_ref, pos_ref,
                      w1_ref, b1_ref, w2_ref, b2_ref, o_ref):
    tok = jnp.dot(patches_ref[...], pw_ref[...],
                  preferred_element_type=jnp.float32)
    tok = tok + pb_ref[...] + pos_ref[...]                       # [tt, D] f32
    h = jnp.dot(tok.astype(jnp.bfloat16), w1_ref[...],
                preferred_element_type=jnp.float32) + b1_ref[...]
    h = jax.nn.gelu(h, approximate=True)
    m = jnp.dot(h.astype(jnp.bfloat16), w2_ref[...],
                preferred_element_type=jnp.float32) + b2_ref[...]
    o_ref[...] = (tok + m).astype(o_ref.dtype)                   # residual in f32


def pallas_encoder_stage(patches, pos, params):
    # patches: [B, T, Pd] bf16 (pre-padded); pos: [B, T, De] f32 (pre-padded)
    B, T, Pd = patches.shape
    De = params["patch_w"].shape[1]
    He = params["enc_mlp_w1"].shape[1]
    tt = min(_TOKEN_TILE, T)
    assert T % tt == 0

    # TODO(synk): for real ViT dims on v7x (64 MiB VMEM) tile the hidden (He)
    # dimension with an inner accumulation loop instead of holding it whole.
    cost = pl.CostEstimate(
        flops=2 * B * T * (Pd * De + De * He + He * De),
        transcendentals=B * T * He,
        bytes_accessed=(B * T * Pd + B * T * De) * 2 + B * T * De * 4
        + (Pd * De + De * He + He * De) * 2,
    )

    return pl.pallas_call(
        _enc_stage_kernel,
        out_shape=jax.ShapeDtypeStruct((B, T, De), jnp.bfloat16),
        grid_spec=pltpu.PrefetchScalarGridSpec(
            num_scalar_prefetch=0,
            grid=(B, T // tt),
            in_specs=[
                pl.BlockSpec((None, tt, Pd), lambda b, j: (b, j, 0)),
                pl.BlockSpec((Pd, De), lambda b, j: (0, 0)),
                pl.BlockSpec((1, De), lambda b, j: (0, 0)),
                pl.BlockSpec((None, tt, De), lambda b, j: (b, j, 0)),
                pl.BlockSpec((De, He), lambda b, j: (0, 0)),
                pl.BlockSpec((1, He), lambda b, j: (0, 0)),
                pl.BlockSpec((He, De), lambda b, j: (0, 0)),
                pl.BlockSpec((1, De), lambda b, j: (0, 0)),
            ],
            out_specs=pl.BlockSpec((None, tt, De), lambda b, j: (b, j, 0)),
        ),
        compiler_params=pltpu.CompilerParams(
            dimension_semantics=("parallel", "parallel"),
            vmem_limit_bytes=_VMEM_LIMIT,
        ),
        cost_estimate=cost,
    )(patches, params["patch_w"], params["patch_b"], pos,
      params["enc_mlp_w1"], params["enc_mlp_b1"],
      params["enc_mlp_w2"], params["enc_mlp_b2"])


# ----------------------------------------------------------------------------
# Pallas kernel 3: fused DECODER tail
#   t = y + dec_pos ; z = t + MLP(t) ; pred = z @ Wpred + bpred
# Grid = (B, tokens/tt); dec_pos is read directly from its [1, L, Dd] param
# via the index_map (no broadcast materialization).
# ----------------------------------------------------------------------------
def _dec_stage_kernel(y_ref, pos_ref, w1_ref, b1_ref, w2_ref, b2_ref,
                      pw_ref, pb_ref, o_ref):
    t = y_ref[...].astype(jnp.float32) + pos_ref[...]            # [tt, Dd] f32
    h = jnp.dot(t.astype(jnp.bfloat16), w1_ref[...],
                preferred_element_type=jnp.float32) + b1_ref[...]
    h = jax.nn.gelu(h, approximate=True)
    m = jnp.dot(h.astype(jnp.bfloat16), w2_ref[...],
                preferred_element_type=jnp.float32) + b2_ref[...]
    z = t + m                                                    # residual in f32
    p = jnp.dot(z.astype(jnp.bfloat16), pw_ref[...],
                preferred_element_type=jnp.float32) + pb_ref[...]
    o_ref[...] = p.astype(o_ref.dtype)


def pallas_decoder_stage(y, pos, params):
    # y: [B, L, Dd] bf16 (pre-padded); pos: [1, L, Dd] f32 (pre-padded)
    B, L, Dd = y.shape
    Hd = params["dec_mlp_w1"].shape[1]
    Pd = params["pred_w"].shape[1]
    tt = min(_TOKEN_TILE, L)
    assert L % tt == 0 and pos.shape == (1, L, Dd)

    cost = pl.CostEstimate(
        flops=2 * B * L * (Dd * Hd + Hd * Dd + Dd * Pd),
        transcendentals=B * L * Hd,
        bytes_accessed=B * L * Dd * 2 + L * Dd * 4 + B * L * Pd * 4
        + (Dd * Hd + Hd * Dd + Dd * Pd) * 2,
    )

    return pl.pallas_call(
        _dec_stage_kernel,
        out_shape=jax.ShapeDtypeStruct((B, L, Pd), jnp.float32),
        grid_spec=pltpu.PrefetchScalarGridSpec(
            num_scalar_prefetch=0,
            grid=(B, L // tt),
            in_specs=[
                pl.BlockSpec((None, tt, Dd), lambda b, j: (b, j, 0)),
                pl.BlockSpec((None, tt, Dd), lambda b, j: (0, j, 0)),
                pl.BlockSpec((Dd, Hd), lambda b, j: (0, 0)),
                pl.BlockSpec((1, Hd), lambda b, j: (0, 0)),
                pl.BlockSpec((Hd, Dd), lambda b, j: (0, 0)),
                pl.BlockSpec((1, Dd), lambda b, j: (0, 0)),
                pl.BlockSpec((Dd, Pd), lambda b, j: (0, 0)),
                pl.BlockSpec((1, Pd), lambda b, j: (0, 0)),
            ],
            out_specs=pl.BlockSpec((None, tt, Pd), lambda b, j: (b, j, 0)),
        ),
        compiler_params=pltpu.CompilerParams(
            dimension_semantics=("parallel", "parallel"),
            vmem_limit_bytes=_VMEM_LIMIT,
        ),
        cost_estimate=cost,
    )(y, pos, params["dec_mlp_w1"], params["dec_mlp_b1"],
      params["dec_mlp_w2"], params["dec_mlp_b2"],
      params["pred_w"], params["pred_b"])


# ----------------------------------------------------------------------------
# Glue: patchify (stride=patch "conv" as reshape + transpose)
# ----------------------------------------------------------------------------
def patchify(x, patch):
    # x: [B, C, H, W] -> [B, L, C*patch*patch]
    B, C, H, W = x.shape
    gh, gw = H // patch, W // patch
    x = x.reshape(B, C, gh, patch, gw, patch)
    x = jnp.transpose(x, (0, 2, 4, 1, 3, 5))           # [B, gh, gw, C, p, p]
    return x.reshape(B, gh * gw, C * patch * patch)


# ----------------------------------------------------------------------------
# Parameters: padded + cast ONCE at init (bf16 weights, f32 [1,Np] biases,
# f32 lane-padded positional embeddings, bf16 mask token).
# ----------------------------------------------------------------------------
def init_params(key, patch_dim, enc_dim, dec_dim, num_patches):
    ks = jax.random.split(key, 12)
    s = 0.02
    Pd = _round_up(patch_dim, 128)
    De = _round_up(enc_dim, 128)
    Dd = _round_up(dec_dim, 128)
    He = _round_up(4 * enc_dim, 128)
    Hd = _round_up(4 * dec_dim, 128)

    def w(k, shape, rp, cp):
        m = (s * jax.random.normal(k, shape)).astype(jnp.float32)
        return _pad2(m, rp, cp).astype(jnp.bfloat16)

    def bias(npad):
        return jnp.zeros((1, npad), jnp.float32)

    def pos(k, n, d, dpad):
        p = (s * jax.random.normal(k, (1, n, d))).astype(jnp.float32)
        return jnp.pad(p, ((0, 0), (0, 0), (0, dpad - d)))

    mask_tok = (s * jax.random.normal(ks[5], (1, 1, dec_dim))).astype(jnp.float32)
    mask_tok = jnp.pad(mask_tok, ((0, 0), (0, 0), (0, Dd - dec_dim)))

    return {
        # encoder
        "patch_w": w(ks[0], (patch_dim, enc_dim), Pd, De),
        "patch_b": bias(De),
        "enc_pos": pos(ks[1], num_patches, enc_dim, De),
        "enc_mlp_w1": w(ks[2], (enc_dim, 4 * enc_dim), De, He),
        "enc_mlp_b1": bias(He),
        "enc_mlp_w2": w(ks[3], (4 * enc_dim, enc_dim), He, De),
        "enc_mlp_b2": bias(De),
        # decoder
        "dec_embed_w": w(ks[4], (enc_dim, dec_dim), De, Dd),
        "dec_embed_b": bias(Dd),
        "mask_token": mask_tok.astype(jnp.bfloat16),
        "dec_pos": pos(ks[6], num_patches, dec_dim, Dd),
        "dec_mlp_w1": w(ks[7], (dec_dim, 4 * dec_dim), Dd, Hd),
        "dec_mlp_b1": bias(Hd),
        "dec_mlp_w2": w(ks[8], (4 * dec_dim, dec_dim), Hd, Dd),
        "dec_mlp_b2": bias(Dd),
        "pred_w": w(ks[9], (dec_dim, patch_dim), Dd, Pd),
        "pred_b": bias(Pd),
    }


# ----------------------------------------------------------------------------
# Encoder: mask -> gather visible patches -> ONE fused Pallas stage
# (row-gather commutes with the linear patch embed, so only visible tokens are
#  embedded; pad/cast to bf16 + lane width happens exactly once here)
# ----------------------------------------------------------------------------
def encoder_forward(params, x, patch, mask_ratio, mask_key):
    B = x.shape[0]
    patches = patchify(x, patch)                        # [B, L, patch_dim] f32
    _, L, pdim = patches.shape
    Pd = params["patch_w"].shape[0]                     # padded patch dim
    De = params["patch_w"].shape[1]                     # padded enc dim

    # deterministic random masking (argsort/gather kept as XLA glue)
    len_keep = int(L * (1.0 - mask_ratio))
    noise = jax.random.uniform(mask_key, (B, L))
    ids_shuffle = jnp.argsort(noise, axis=1)            # [B, L]
    ids_restore = jnp.argsort(ids_shuffle, axis=1)      # [B, L]
    ids_keep = ids_shuffle[:, :len_keep]                # [B, len_keep]

    patches_vis = jnp.take_along_axis(patches, ids_keep[:, :, None], axis=1)
    pos_vis = jnp.take_along_axis(
        jnp.broadcast_to(params["enc_pos"], (B, L, De)),
        ids_keep[:, :, None], axis=1)                   # [B, len_keep, De] f32

    # single pad + bf16 cast at pipeline entry
    tt, Tkp = _token_tile(len_keep)
    patches_p = jnp.pad(
        patches_vis, ((0, 0), (0, Tkp - len_keep), (0, Pd - pdim))
    ).astype(jnp.bfloat16)
    pos_p = pos_vis if Tkp == len_keep else jnp.pad(
        pos_vis, ((0, 0), (0, Tkp - len_keep), (0, 0)))

    # fused patch-embed + pos + GELU MLP + residual (one kernel)
    enc_out = pallas_encoder_stage(patches_p, pos_p, params)   # [B, Tkp, De] bf16
    enc_out = enc_out[:, :len_keep, :]

    mask = jnp.ones((B, L), jnp.float32).at[:, :len_keep].set(0.0)
    mask = jnp.take_along_axis(mask, ids_restore, axis=1)
    return enc_out, mask, ids_restore


# ----------------------------------------------------------------------------
# Decoder: embed (Pallas linear) -> append mask tokens -> unshuffle ->
#          ONE fused Pallas tail (pos + MLP + residual + predictor)
# ----------------------------------------------------------------------------
def decoder_forward(params, enc_tuple, x, patch_dim):
    enc_out, mask, ids_restore = enc_tuple              # enc_out: bf16, lane-padded
    B, len_keep, De = enc_out.shape
    L = ids_restore.shape[1]
    Dd = params["dec_embed_w"].shape[1]

    # decoder embedding of visible tokens (tiled Pallas matmul, bf16 in/out)
    y = pallas_linear(enc_out.reshape(B * len_keep, De),
                      params["dec_embed_w"], params["dec_embed_b"])
    y = y.reshape(B, len_keep, Dd)

    # append mask tokens and unshuffle to original token order (XLA glue —
    # data-dependent token gather has no clean static BlockSpec equivalent)
    mask_tokens = jnp.broadcast_to(params["mask_token"], (B, L - len_keep, Dd))
    y_full = jnp.concatenate([y, mask_tokens], axis=1)          # [B, L, Dd] bf16
    y_full = jnp.take_along_axis(y_full, ids_restore[:, :, None], axis=1)

    tt, Lp = _token_tile(L)
    y_p = y_full if Lp == L else jnp.pad(y_full, ((0, 0), (0, Lp - L), (0, 0)))
    pos_p = params["dec_pos"]
    if Lp != L:
        pos_p = jnp.pad(pos_p, ((0, 0), (0, Lp - L), (0, 0)))

    # fused pos-add + GELU MLP + residual + pixel predictor (one kernel)
    pred = pallas_decoder_stage(y_p, pos_p, params)             # [B, Lp, Pd] f32
    return pred[:, :L, :patch_dim]                               # single exit slice


# ----------------------------------------------------------------------------
# MAE.forward
# ----------------------------------------------------------------------------
def mae_forward(params, x, *, patch, mask_ratio, mask_key):
    C = x.shape[1]
    patch_dim = C * patch * patch
    encoder_op, mask, ids_restore = encoder_forward(
        params, x, patch, mask_ratio, mask_key)
    decoder_op = decoder_forward(
        params, (encoder_op, mask, ids_restore), x, patch_dim)
    return decoder_op


if __name__ == "__main__":
    key = jax.random.PRNGKey(0)
    k_x, k_p, k_m = jax.random.split(key, 3)

    # small shapes: B=2, C=4, H=W=16, patch=4 -> L=16 tokens, patch_dim=64
    B, C, H, W = 2, 4, 16, 16
    patch = 4
    L = (H // patch) * (W // patch)
    patch_dim = C * patch * patch
    enc_dim, dec_dim = 32, 32
    mask_ratio = 0.5

    x = jax.random.normal(k_x, (B, C, H, W), dtype=jnp.float32)
    params = init_params(k_p, patch_dim, enc_dim, dec_dim, L)

    out = mae_forward(params, x, patch=patch, mask_ratio=mask_ratio, mask_key=k_m)
    out = jax.block_until_ready(out)
    assert out.shape == (B, L, patch_dim), out.shape
    assert bool(jnp.isfinite(out).all())
    print("KERNEL_OK")
</pallas_src>

<mosaic_0001>
module attributes {stable_mosaic.version = 11 : i64} {
  func.func @_enc_stage_kernel(%arg0: i32, %arg1: i32, %arg2: memref<1x8x128xbf16, #tpu.memory_space<vmem>>, %arg3: memref<128x128xbf16, #tpu.memory_space<vmem>>, %arg4: memref<1x128xf32, #tpu.memory_space<vmem>>, %arg5: memref<1x8x128xf32, #tpu.memory_space<vmem>>, %arg6: memref<128x128xbf16, #tpu.memory_space<vmem>>, %arg7: memref<1x128xf32, #tpu.memory_space<vmem>>, %arg8: memref<128x128xbf16, #tpu.memory_space<vmem>>, %arg9: memref<1x128xf32, #tpu.memory_space<vmem>>, %arg10: memref<1x8x128xbf16, #tpu.memory_space<vmem>>) attributes {dimension_semantics = [#tpu.dimension_semantics<parallel>, #tpu.dimension_semantics<parallel>], iteration_bounds = array<i64: 2, 1>, scalar_prefetch = 0 : i64, scratch_operands = 0 : i64, tpu.core_type = #tpu.core_type<tc>, window_params = [{transform_indices = @transform_0, window_bounds = array<i64: 1, 8, 128>}, {pipeline_mode = #tpu.pipeline_mode<synchronous>, transform_indices = @transform_1, window_bounds = array<i64: 128, 128>}, {pipeline_mode = #tpu.pipeline_mode<synchronous>, transform_indices = @transform_2, window_bounds = array<i64: 1, 128>}, {transform_indices = @transform_3, window_bounds = array<i64: 1, 8, 128>}, {pipeline_mode = #tpu.pipeline_mode<synchronous>, transform_indices = @transform_4, window_bounds = array<i64: 128, 128>}, {pipeline_mode = #tpu.pipeline_mode<synchronous>, transform_indices = @transform_5, window_bounds = array<i64: 1, 128>}, {pipeline_mode = #tpu.pipeline_mode<synchronous>, transform_indices = @transform_6, window_bounds = array<i64: 128, 128>}, {pipeline_mode = #tpu.pipeline_mode<synchronous>, transform_indices = @transform_7, window_bounds = array<i64: 1, 128>}, {transform_indices = @transform_8, window_bounds = array<i64: 1, 8, 128>}]} {
    %c0 = arith.constant 0 : index
    %c0_0 = arith.constant 0 : index
    %c0_1 = arith.constant 0 : index
    %0 = vector.load %arg2[%c0, %c0_0, %c0_1] : memref<1x8x128xbf16, #tpu.memory_space<vmem>>, vector<1x8x128xbf16>
    %1 = vector.shape_cast %0 : vector<1x8x128xbf16> to vector<8x128xbf16>
    %c0_2 = arith.constant 0 : index
    %c0_3 = arith.constant 0 : index
    %2 = vector.load %arg3[%c0_2, %c0_3] : memref<128x128xbf16, #tpu.memory_space<vmem>>, vector<128x128xbf16>
    %cst = arith.constant dense<0.000000e+00> : vector<8x128xf32>
    %3 = tpu.matmul %1, %2, %cst {dimension_numbers = #tpu.dot_dimension_numbers<[1], [0], [0], [1], [0, 0, 1, 1], [], []>} : vector<8x128xbf16>, vector<128x128xbf16>, vector<8x128xf32> -> vector<8x128xf32>
    %c0_4 = arith.constant 0 : index
    %c0_5 = arith.constant 0 : index
    %4 = vector.load %arg4[%c0_4, %c0_5] : memref<1x128xf32, #tpu.memory_space<vmem>>, vector<1x128xf32>
    %5 = vector.broadcast %4 : vector<1x128xf32> to vector<8x128xf32>
    %6 = arith.addf %3, %5 : vector<8x128xf32>
    %c0_6 = arith.constant 0 : index
    %c0_7 = arith.constant 0 : index
    %c0_8 = arith.constant 0 : index
    %7 = vector.load %arg5[%c0_6, %c0_7, %c0_8] : memref<1x8x128xf32, #tpu.memory_space<vmem>>, vector<1x8x128xf32>
    %8 = vector.shape_cast %7 : vector<1x8x128xf32> to vector<8x128xf32>
    %9 = arith.addf %6, %8 : vector<8x128xf32>
    %10 = arith.truncf %9 : vector<8x128xf32> to vector<8x128xbf16>
    %c0_9 = arith.constant 0 : index
    %c0_10 = arith.constant 0 : index
    %11 = vector.load %arg6[%c0_9, %c0_10] : memref<128x128xbf16, #tpu.memory_space<vmem>>, vector<128x128xbf16>
    %cst_11 = arith.constant dense<0.000000e+00> : vector<8x128xf32>
    %12 = tpu.matmul %10, %11, %cst_11 {dimension_numbers = #tpu.dot_dimension_numbers<[1], [0], [0], [1], [0, 0, 1, 1], [], []>} : vector<8x128xbf16>, vector<128x128xbf16>, vector<8x128xf32> -> vector<8x128xf32>
    %c0_12 = arith.constant 0 : index
    %c0_13 = arith.constant 0 : index
    %13 = vector.load %arg7[%c0_12, %c0_13] : memref<1x128xf32, #tpu.memory_space<vmem>>, vector<1x128xf32>
    %14 = vector.broadcast %13 : vector<1x128xf32> to vector<8x128xf32>
    %15 = arith.addf %12, %14 : vector<8x128xf32>
    %16 = arith.mulf %15, %15 : vector<8x128xf32>
    %17 = arith.mulf %15, %16 : vector<8x128xf32>
    %cst_14 = arith.constant 4.471500e-02 : f32
    %18 = vector.broadcast %cst_14 : f32 to vector<8x128xf32>
    %19 = arith.mulf %18, %17 : vector<8x128xf32>
    %20 = arith.addf %15, %19 : vector<8x128xf32>
    %cst_15 = arith.constant 0.797884583 : f32
    %21 = vector.broadcast %cst_15 : f32 to vector<8x128xf32>
    %22 = arith.mulf %21, %20 : vector<8x128xf32>
    %23 = math.tanh %22 : vector<8x128xf32>
    %cst_16 = arith.constant 1.000000e+00 : f32
    %24 = vector.broadcast %cst_16 : f32 to vector<8x128xf32>
    %25 = arith.addf %24, %23 : vector<8x128xf32>
    %cst_17 = arith.constant 5.000000e-01 : f32
    %26 = vector.broadcast %cst_17 : f32 to vector<8x128xf32>
    %27 = arith.mulf %26, %25 : vector<8x128xf32>
    %28 = arith.mulf %15, %27 : vector<8x128xf32>
    %29 = arith.truncf %28 : vector<8x128xf32> to vector<8x128xbf16>
    %c0_18 = arith.constant 0 : index
    %c0_19 = arith.constant 0 : index
    %30 = vector.load %arg8[%c0_18, %c0_19] : memref<128x128xbf16, #tpu.memory_space<vmem>>, vector<128x128xbf16>
    %cst_20 = arith.constant dense<0.000000e+00> : vector<8x128xf32>
    %31 = tpu.matmul %29, %30, %cst_20 {dimension_numbers = #tpu.dot_dimension_numbers<[1], [0], [0], [1], [0, 0, 1, 1], [], []>} : vector<8x128xbf16>, vector<128x128xbf16>, vector<8x128xf32> -> vector<8x128xf32>
    %c0_21 = arith.constant 0 : index
    %c0_22 = arith.constant 0 : index
    %32 = vector.load %arg9[%c0_21, %c0_22] : memref<1x128xf32, #tpu.memory_space<vmem>>, vector<1x128xf32>
    %33 = vector.broadcast %32 : vector<1x128xf32> to vector<8x128xf32>
    %34 = arith.addf %31, %33 : vector<8x128xf32>
    %35 = arith.addf %9, %34 : vector<8x128xf32>
    %36 = arith.truncf %35 : vector<8x128xf32> to vector<8x128xbf16>
    %c0_23 = arith.constant 0 : index
    %c0_24 = arith.constant 0 : index
    %c0_25 = arith.constant 0 : index
    %37 = vector.load %arg10[%c0_23, %c0_24, %c0_25] : memref<1x8x128xbf16, #tpu.memory_space<vmem>>, vector<1x8x128xbf16>
    %38 = vector.shape_cast %37 : vector<1x8x128xbf16> to vector<8x128xbf16>
    %39 = vector.shape_cast %36 : vector<8x128xbf16> to vector<1x8x128xbf16>
    tpu.vector_store %arg10[%c0_23, %c0_24, %c0_25], %39 {strides = array<i32>} : memref<1x8x128xbf16, #tpu.memory_space<vmem>>, vector<1x8x128xbf16>,
    return
  }
  func.func @transform_0(%arg0: i32, %arg1: i32) -> (i32, i32, i32) {
    %c0_i32 = arith.constant 0 : i32
    %c0_i32_0 = arith.constant 0 : i32
    return %arg0, %arg1, %c0_i32 : i32, i32, i32
  }
  func.func @transform_1(%arg0: i32, %arg1: i32) -> (i32, i32) {
    %c0_i32 = arith.constant 0 : i32
    %c0_i32_0 = arith.constant 0 : i32
    %c0_i32_1 = arith.constant 0 : i32
    return %c0_i32, %c0_i32_0 : i32, i32
  }
  func.func @transform_2(%arg0: i32, %arg1: i32) -> (i32, i32) {
    %c0_i32 = arith.constant 0 : i32
    %c0_i32_0 = arith.constant 0 : i32
    %c0_i32_1 = arith.constant 0 : i32
    return %c0_i32, %c0_i32_0 : i32, i32
  }
  func.func @transform_3(%arg0: i32, %arg1: i32) -> (i32, i32, i32) {
    %c0_i32 = arith.constant 0 : i32
    %c0_i32_0 = arith.constant 0 : i32
    return %arg0, %arg1, %c0_i32 : i32, i32, i32
  }
  func.func @transform_4(%arg0: i32, %arg1: i32) -> (i32, i32) {
    %c0_i32 = arith.constant 0 : i32
    %c0_i32_0 = arith.constant 0 : i32
    %c0_i32_1 = arith.constant 0 : i32
    return %c0_i32, %c0_i32_0 : i32, i32
  }
  func.func @transform_5(%arg0: i32, %arg1: i32) -> (i32, i32) {
    %c0_i32 = arith.constant 0 : i32
    %c0_i32_0 = arith.constant 0 : i32
    %c0_i32_1 = arith.constant 0 : i32
    return %c0_i32, %c0_i32_0 : i32, i32
  }
  func.func @transform_6(%arg0: i32, %arg1: i32) -> (i32, i32) {
    %c0_i32 = arith.constant 0 : i32
    %c0_i32_0 = arith.constant 0 : i32
    %c0_i32_1 = arith.constant 0 : i32
    return %c0_i32, %c0_i32_0 : i32, i32
  }
  func.func @transform_7(%arg0: i32, %arg1: i32) -> (i32, i32) {
    %c0_i32 = arith.constant 0 : i32
    %c0_i32_0 = arith.constant 0 : i32
    %c0_i32_1 = arith.constant 0 : i32
    return %c0_i32, %c0_i32_0 : i32, i32
  }
  func.func @transform_8(%arg0: i32, %arg1: i32) -> (i32, i32, i32) {
    %c0_i32 = arith.constant 0 : i32
    %c0_i32_0 = arith.constant 0 : i32
    return %arg0, %arg1, %c0_i32 : i32, i32, i32
  }
}

</mosaic_0001>

<bundles_post_ra>
// kernel: tpu_custom_call.1
= control target key start
LH: loop header
LB: loop body
LE: loop exit
PB: predicated region body
PF: predicated region fallthrough
CT: control target
= control target key end

     0   :  { %s1745_s0 = inlined_call_operand.hbm [shape: bf16[2,8,128], index: 0, kind: input, shape index: {}]   ;;  %s1746_s1 = inlined_call_operand.hbm [shape: bf16[128,128], index: 1, kind: input, shape index: {}]   ;;  %s1747_s2 = inlined_call_operand.vmem [shape: f32[1,128], index: 2, kind: input, shape index: {}]   ;;  %s1748_s3 = inlined_call_operand.hbm [shape: f32[2,8,128], index: 3, kind: input, shape index: {}]   ;;  %s1749_s4 = inlined_call_operand.hbm [shape: bf16[128,128], index: 4, kind: input, shape index: {}]   ;;  %s1750_s5 = inlined_call_operand.vmem [shape: f32[1,128], index: 5, kind: input, shape index: {}]   ;;  %s1751_s6 = inlined_call_operand.hbm [shape: bf16[128,128], index: 6, kind: input, shape index: {}]   ;;  %s1752_s7 = inlined_call_operand.vmem [shape: f32[1,128], index: 7, kind: input, shape index: {}]   ;;  %s1753_s8 = inlined_call_operand.hbm [shape: bf16[2,8,128], index: 8, kind: output, shape index: {}]  }
   0x1   :  { %1766 = sst [smem:[#allocation21_spill]] %s1745_s0 }
   0x2   :  { %1767 = sst [smem:[#allocation22_spill]] %s1746_s1 }
   0x3   :  { %1768 = sst [smem:[#allocation23_spill]] %s1752_s7 }
   0x4   :  { %1769 = sst [smem:[#allocation24_spill]] %s1753_s8 }
   0x5   :  { %13 = vsyncpa [#allocation3], 0 }
   0x6   :  { %15 = vsyncpa [#allocation3 + $0x1], 0 }
   0x7   :  { %16 = vsyncpa [#allocation6], 0 }
   0x8   :  { %17 = vsyncpa [#allocation10], 0 }
   0x9   :  { %18 = vsyncpa [#allocation4], 0 }
   0xa   :  { %20 = vsyncpa [#allocation4 + $0x1], 0  ;;  %s1466_s27 = smov 0   ;;  %s1468_s28 = smov 0  }
   0xb   :  { %s1470_s29 = smov 0   ;;  %s1472_s30 = smov 0  }
   0xc   :  { %s1474_s9 = smov 0   ;;  %s1476_s10 = smov 0  }
   0xd LB: > { %1770 = sst [smem:[#allocation18_spill]] %s1389_s27  ;;  %s1497_s11 = sadd.s32 4294967295, %s1409_s10   ;;  %s1409_s10 = sphi %s1476_s10, %s26_s10   ;;  %s1405_s9 = sphi %s1474_s9, %s1806_s9   ;;  %s1401_s30 = sphi %s1472_s30, %s1805_s30   ;;  %s1397_s29 = sphi %s1470_s29, %s1804_s29   ;;  %s1393_s28 = sphi %s1468_s28, %s1803_s28   ;;  %s1389_s27 = sphi %s1466_s27, %s1802_s27  }
   0xe   : > { %s916_s12 = sadd.s32 4294967294, %s1409_s10   ;;  %p60_p0 = scmp.ne.s32.totalorder %s1393_s28, %s1389_s27 }
   0xf   : > { %p1762_p1 = scmp.eq.s32.totalorder %s1497_s11, 0  ;;  %p246_p3 = scmp.eq.s32.totalorder %s916_s12, 1 }
  0x10   : > { %p917_p5 = scmp.ge.s32.totalorder %s1409_s10, 1  ;;  %p253_p7 = scmp.lt.s32.totalorder %s1409_s10, 3 }
  0x11   : > { %p1506_p4 = por %p1762_p1, %p60_p0  ;;  %p1511_p6 = por %p246_p3, %p60_p0 }
  0x12   : > { %p1516_p8 = pnand %p917_p5, %p253_p7  ;;  %s1411_s16 = smov [#allocation5]  }
  0x13   : > { %s1772_s14 = scalar_select %p1511_p6, 1, 0 }
  0x14   : > { %s265_s17 = sshll.u32 %s1411_s16, 4  ;;  %p1069_p9 = pneg %p1516_p8  ;;  %s266_s17 = int_to_ptr.vmem [resolvable:$true] %s265_s17 }
  0x15   : > { %1773 = sst [smem:[#allocation19_spill]] %s1772_s14  ;;  %s38_s19 = sadd.s32 1, %s1405_s9 }
  0x16   : > { %p1525_p11 = pnand %p1069_p9, %p1762_p1  ;;  %s1190_s20 = scalar_lea.vmem %s266_s17, 1024 }
  0x17   : > { %p1191_p13 = scmp.ne.s32.totalorder %s266_s17, %s1190_s20  ;;  %p1198_p5 = scmp.lt.s32.totalorder %s266_s17, %s266_s17 }
  0x18   : > { %p1763_p12 = pneg %p1525_p11  ;;  %p1199_p7 = scmp.lt.s32.totalorder %s1190_s20, %s1190_s20 }
  0x1a   : > { %p1193_p0 = pnand %p1191_p13, %p1763_p12  ;;  %p1200_p2 = por %p1199_p7, %p1198_p5 }
  0x1c   : > { %p1194_p3 = pneg %p1193_p0 }
  0x1e   : > { %p1201_p10 = pnand %p1200_p2, %p1194_p3 }
  0x20   : > { %1204 = shalt.err (!%p1201_p10)
}
  0x21   : > { %s1754_s21 = smov 64   ;;  %s1756_s22 = smov 4  }
  0x22   : > { %s1776_s1 = sld [smem:[#allocation22_spill]]  ;;  %p40_p2 = scmp.ge.s32.totalorder %s38_s19, 2 }
  0x23   : > { %s47_s25 = sadd.s32 1, %s1397_s29  ;;  %p54_p9 = scmp.ne.s32.totalorder %s1397_s29, %s1393_s28 }
  0x24   : > { %p55_p10 = scmp.eq.s32.totalorder %s1409_s10, 0  ;;  %s1808_s19 = smov (%p40_p2, %s38_s19), 0 }
  0x25   : > { %1777 = sst [smem:[#allocation20_spill]] %s1808_s19  ;;  %p1779_p0 = scmp.eq.s32.totalorder %s1497_s11, 1 }
  0x26   : > { %p1549_p13 = por %p55_p10, %p54_p9  ;;  %s42_s16 = ssub.s32 %s1405_s9, %s1808_s19 }
  0x27   : > { %p1555_p3 = por %p1779_p0, %p54_p9  ;;  %p1093_p5 = scmp.lt.s32.totalorder %s1409_s10, 2 }
  0x28   : > { %1072 = dma.hbm_to_vmem [thread:$0]  (!%p1525_p11), %s1776_s1, 1024, %s266_s17, [#allocation6], %s1754_s21, %s1754_s21, %s1756_s22  }
  0x29   : > { %s1780_s12 = scalar_select %p1555_p3, 1, 0 }
  0x2a   : > { %p45_p7 = scmp.eq.s32.totalorder %s42_s16, 0  ;;  %s314_s17 = sand.u32 1, %s1409_s10  }
  0x2b   : > { %s316_s20 = sand.u32 1, %s1397_s29   ;;  %s923_s21 = sshll.u32 %s1405_s9, 6 }
  0x2c   : > { %s1565_s23 = scalar_select %p45_p7, %s1397_s29, %s47_s25  }
  0x2d   : > { %s922_s24 = sshll.u32 %s316_s20, 2  ;;  %s1781_s0 = sld [smem:[#allocation21_spill]] }
  0x2e   : > { %s318_s27 = scalar_lea.vmem [#allocation2], %s922_s24  ;;  %p1573_p2 = pnand %p1093_p5, %p1549_p13 }
  0x2f   : > { %s326_s8 = sshll.u32 %s318_s27, 4  ;;  %s1577_s16 = sshll.u32 %s316_s20, 3  ;;  %s327_s8 = int_to_ptr.vmem [resolvable:$true] %s326_s8 }
  0x30   : > { %s1579_s25 = scalar_lea.sflag [#allocation3], %s314_s17  ;;  %p1764_p9 = pneg %p1573_p2 }
  0x31   : > { %s1218_s19 = scalar_lea.vmem %s327_s8, 64  ;;  %s1414_s1 = smov [#allocation2]  }
  0x32   : > { %p1219_p10 = scmp.ne.s32.totalorder %s327_s8, %s1218_s19  ;;  %s1223_s27 = sshll.u32 %s1414_s1, 4  ;;  %s1224_s27 = int_to_ptr.vmem [resolvable:$false] %s1223_s27 }
  0x33   : > { %s324_s14 = scalar_lea.hbm %s1781_s0, %s923_s21  ;;  %s1225_s21 = scalar_lea.vmem %s1224_s27, 128 }
  0x34   : > { %p1221_p0 = pnand %p1219_p10, %p1764_p9  ;;  %p1226_p13 = scmp.lt.s32.totalorder %s327_s8, %s1224_s27 }
  0x35   : > { %p1227_p5 = scmp.lt.s32.totalorder %s1225_s21, %s1218_s19 }
  0x36   : > { %p1222_p7 = pneg %p1221_p0 }
  0x37   : > { %p1228_p1 = por %p1227_p5, %p1226_p13 }
  0x39   : > { %p1229_p12 = pnand %p1228_p1, %p1222_p7 }
  0x3b   : > { %1232 = shalt.err (!%p1229_p12)
}
  0x3c   : > { %1082 = dma.hbm_to_vmem [thread:$0]  (!%p1573_p2), %s324_s14, 64, %s327_s8, %s1579_s25  }
  0x3d   : > { %s1415_s22 = smov [#allocation8]   ;;  %s1416_s17 = smov [#allocation9]  }
  0x3e   : > { %s281_s26 = sshll.u32 %s1415_s22, 4  ;;  %s297_s20 = sshll.u32 %s1416_s17, 4  ;;  %s282_s26 = int_to_ptr.vmem [resolvable:$true] %s281_s26  ;;  %s298_s20 = int_to_ptr.vmem [resolvable:$true] %s297_s20 }
  0x3f   : > { %s1244_s24 = scalar_lea.vmem %s282_s26, 1024  ;;  %p1783_p0 = pneg %p1525_p11 }
  0x40   : > { %p1245_p10 = scmp.ne.s32.totalorder %s282_s26, %s1244_s24  ;;  %p1252_p3 = scmp.lt.s32.totalorder %s282_s26, %s282_s26 }
  0x41   : > { %p1253_p13 = scmp.lt.s32.totalorder %s1244_s24, %s1244_s24 }
  0x42   : > { %p1247_p9 = pnand %p1245_p10, %p1783_p0 }
  0x43   : > { %p1254_p1 = por %p1253_p13, %p1252_p3 }
  0x44   : > { %p1248_p6 = pneg %p1247_p9 }
  0x46   : > { %p1255_p12 = pnand %p1254_p1, %p1248_p6 }
  0x48   : > { %1258 = shalt.err (!%p1255_p12)
}
  0x49   : > { %s1784_s19 = smov 4   ;;  %s1785_s8 = smov 64  }
  0x4a   : > { %1075 = dma.hbm_to_vmem [thread:$0]  (!%p1525_p11), %s1749_s4, 1024, %s282_s26, [#allocation6], %s1785_s8, %s1785_s8, %s1784_s19  }
  0x4b   : > { %s1270_s27 = scalar_lea.vmem %s298_s20, 1024  ;;  %p1786_p9 = pmov %p1783_p0 }
  0x4c   : > { %p1271_p7 = scmp.ne.s32.totalorder %s298_s20, %s1270_s27  ;;  %p1278_p3 = scmp.lt.s32.totalorder %s298_s20, %s298_s20 }
  0x4d   : > { %p1279_p6 = scmp.lt.s32.totalorder %s1270_s27, %s1270_s27 }
  0x4e   : > { %p1273_p5 = pnand %p1271_p7, %p1786_p9 }
  0x4f   : > { %p1280_p0 = por %p1279_p6, %p1278_p3 }
  0x50   : > { %p1274_p10 = pneg %p1273_p5 }
  0x52   : > { %p1281_p13 = pnand %p1280_p0, %p1274_p10 }
  0x54   : > { %1284 = shalt.err (!%p1281_p13)
}
  0x55   : > { %1078 = dma.hbm_to_vmem [thread:$0]  (!%p1525_p11), %s1751_s6, 1024, %s298_s20, [#allocation10], %s1785_s8, %s1785_s8, %s1784_s19  }
  0x56   : > { %s925_s26 = sshll.u32 %s1405_s9, 7  ;;  %s337_s17 = scalar_lea.vmem [#allocation7], %s1577_s16 }
  0x57   : > { %s345_s24 = sshll.u32 %s337_s17, 4  ;;  %s343_s27 = scalar_lea.hbm %s1748_s3, %s925_s26  ;;  %s346_s24 = int_to_ptr.vmem [resolvable:$true] %s345_s24 }
  0x58   : > { %s1298_s0 = scalar_lea.vmem %s346_s24, 128  ;;  %p1787_p12 = pneg %p1573_p2 }
  0x59   : > { %p1299_p1 = scmp.ne.s32.totalorder %s346_s24, %s1298_s0  ;;  %s1417_s18 = smov [#allocation7]  }
  0x5a   : > { %s1303_s21 = sshll.u32 %s1417_s18, 4  ;;  %s1304_s21 = int_to_ptr.vmem [resolvable:$false] %s1303_s21 }
  0x5b   : > { %p1301_p7 = pnand %p1299_p1, %p1787_p12  ;;  %s1305_s22 = scalar_lea.vmem %s1304_s21, 256 }
  0x5c   : > { %p1306_p5 = scmp.lt.s32.totalorder %s346_s24, %s1304_s21  ;;  %p1307_p11 = scmp.lt.s32.totalorder %s1305_s22, %s1298_s0 }
  0x5d   : > { %p1302_p9 = pneg %p1301_p7 }
  0x5e   : > { %p1308_p10 = por %p1307_p11, %p1306_p5 }
  0x60   : > { %p1309_p3 = pnand %p1308_p10, %p1302_p9 }
  0x62   : > { %1312 = shalt.err (!%p1309_p3)
}
  0x63   : > { %1085 = dma.hbm_to_vmem [thread:$0]  (!%p1573_p2), %s343_s27, 128, %s346_s24, %s1579_s25  }
  0x64   : > { %354 = sbr.rel (%p1516_p8) target bundleno = 790 (0x316), region = 52  ;;  %s356_s16 = sand.u32 (!%p1516_p8), 1, %s1497_s11  }
  0x65   : > { %s1626_s20 = sand.u32 (!%p1516_p8), 1, %s1393_s28   ;;  %s357_s0 = scalar_lea.sflag (!%p1516_p8), [#allocation3], %s356_s16 }
  0x66   : > { %s927_s19 = sshll.u32 (!%p1516_p8), %s1626_s20, 2 }
  0x67   : > { %s1631_s8 = scalar_lea.vmem (!%p1516_p8), [#allocation2], %s927_s19 }
  0x69   : > { %1364 = dma.done.wait (%p1506_p4), %s357_s0, 64  }
  0x6a   : > { %1366 = vsyncadd (%p1506_p4), %s357_s0, 4294967232  ;;  %p1788_p8 = scmp.eq.s32.totalorder %s1497_s11, 0 }
  0x6c   : > { %1368 = dma.done.wait (%p1788_p8), [#allocation6], 1024   ;;  %p1789_p2 = pmov %p1788_p8 }
  0x6d   : > { %s929_s7 = sshll.u32 %s1626_s20, 3 }
  0x6e   : > { %1370 = vsyncadd (%p1789_p2), [#allocation6], 4294966272  ;;  %s1642_s15 = scalar_lea.vmem [#allocation7], %s929_s7 }
  0x6f   : > { %1372 = dma.done.wait (%p1506_p4), %s357_s0, 128  }
  0x70   : > { %1374 = vsyncadd (%p1506_p4), %s357_s0, 4294967168  ;;  %p1790_p6 = pmov %p1789_p2 }
  0x71   : > { %p1791_p0 = pmov %p1789_p2 }
  0x72   : > { %1376 = dma.done.wait (%p1790_p6), [#allocation6], 1024  }
  0x73   : > { %1378 = vsyncadd (%p1791_p0), [#allocation6], 4294966272  ;;  %p1792_p13 = pmov %p1791_p0 }
  0x74   : > { %p1793_p1 = pmov %p1791_p0 }
  0x75   : > { %1380 = dma.done.wait (%p1792_p13), [#allocation10], 1024  }
  0x76   : > { %1382 = vsyncadd (%p1793_p1), [#allocation10], 4294966272  ;;  %v1418_v0 = vmov 0.0   ;;  %vm1419_vm0 = vmmov 0   ;;  %v1153_v1 = vld [vmem:[#allocation5 + $0x38] sm:$0xff]   ;;  %v1154_v2 = vld [vmem:[#allocation5 + $0x30] sm:$0xff]  }
  0x77   : > { %991 = vmatprep.subr.bf16.mxu0 %v1418_v0  ;;  %1007 = vmatprep.mubr.msk.bf16.mxu0 %vm1419_vm0, %v1418_v0  ;;  %v1155_v3 = vld [vmem:[#allocation5 + $0x28] sm:$0xff]   ;;  %v1156_v5 = vld [vmem:[#allocation5 + $0x20] sm:$0xff]   ;;  %v1157_v7 = vld [vmem:[#allocation5 + $0x18] sm:$0xff]   ;;  %s1794_s14 = sld [smem:[#allocation23_spill]]  ;;  %s961_s1 = sshll.u32 %s1401_s30, 6 }
  0x78   : > { %1011 = vmatprep.subr.bf16.mxu1 %v1418_v0  ;;  %1027 = vmatprep.mubr.msk.bf16.mxu1 %vm1419_vm0, %v1418_v0  ;;  %v1161_v4 = vld [vmem:[#allocation8 + $0x38] sm:$0xff]   ;;  %v1162_v6 = vld [vmem:[#allocation8 + $0x30] sm:$0xff]   ;;  %v1163_v8 = vld [vmem:[#allocation8 + $0x28] sm:$0xff]   ;;  %s418_s27 = scalar_lea.vmem [#allocation11], %s927_s19  ;;  %s1795_s16 = sld [smem:[#allocation24_spill]] }
  0x79   : > { %992 = vmatpush3.bf16.msra.mxu0 %v1153_v1  ;;  %1012 = vmatpush3.bf16.msra.mxu1 %v1161_v4  ;;  %v1158_v9 = vld [vmem:[#allocation5 + $0x10] sm:$0xff]   ;;  %v1159_v11 = vld [vmem:[#allocation5 + $0x8] sm:$0xff]   ;;  %v1160_v13 = vld [vmem:[#allocation5] sm:$0xff]   ;;  %s785_s18 = sshll.u32 %s418_s27, 4  ;;  %p1796_p12 = scmp.ne.s32.totalorder %s1780_s12, 0  ;;  %s786_s18 = int_to_ptr.vmem [resolvable:$true] %s785_s18 }
  0x7a   : > { %993 = vmatprep.subr.bf16.mxu0 %v1418_v0  ;;  %1013 = vmatprep.subr.bf16.mxu1 %v1418_v0  ;;  %v1164_v10 = vld [vmem:[#allocation8 + $0x20] sm:$0xff]   ;;  %v1165_v12 = vld [vmem:[#allocation8 + $0x18] sm:$0xff]   ;;  %v1166_v14 = vld [vmem:[#allocation8 + $0x10] sm:$0xff]   ;;  %s1313_s7 = scalar_lea.vmem %s786_s18, 64  ;;  %s1420_s30 = smov [#allocation11]  }
  0x7b   : > { %v420_v15 = vld [vmem:[%s1631_s8] sm:$0xf]  ;;  %v1168_v17 = vld [vmem:[#allocation8] sm:$0xff]   ;;  %v532_v20 = vld [vmem:[%s1642_s15] sm:$0xff]  ;;  %s771_s8 = scalar_lea.sflag [#allocation4], %s1626_s20  ;;  %p1314_p4 = scmp.ne.s32.totalorder %s786_s18, %s1313_s7 }
  0x7c   : > { %v1167_v16 = vld [vmem:[#allocation8 + $0x8] sm:$0xff]   ;;  %v1169_v27 = vld [vmem:[#allocation9 + $0x38] sm:$0xff]   ;;  %v1170_v28 = vld [vmem:[#allocation9 + $0x30] sm:$0xff]   ;;  %s1317_s19 = sshll.u32 %s1420_s30, 4  ;;  %s1318_s19 = int_to_ptr.vmem [resolvable:$false] %s1317_s19 }
  0x7d   : > { %994 = vmatpush3.bf16.msra.mxu0 %v1154_v2  ;;  %1014 = vmatpush3.bf16.msra.mxu1 %v1162_v6  ;;  %v933_v18 = vld [vmem:[%s1747_s2] ss:$0 sm:$0xff]  ;;  %v1172_v30 = vld [vmem:[#allocation9 + $0x20] sm:$0xff]   ;;  %v1173_v31 = vld [vmem:[#allocation9 + $0x18] sm:$0xff]   ;;  %p1315_p7 = pnand %p1314_p4, %p1796_p12  ;;  %s1319_s15 = scalar_lea.vmem %s1318_s19, 128 }
  0x7e   : > { %995 = vmatprep.subr.bf16.mxu0 %v1418_v0  ;;  %1015 = vmatprep.subr.bf16.mxu1 %v1418_v0  ;;  %v1171_v29 = vld [vmem:[#allocation9 + $0x28] sm:$0xff]   ;;  %v1174_v32 = vld [vmem:[#allocation9 + $0x10] sm:$0xff]   ;;  %v1176_v34 = vld [vmem:[#allocation9] sm:$0xff]   ;;  %s1703_s0 = scalar_lea.hbm %s1795_s16, %s961_s1  ;;  %p1320_p5 = scmp.lt.s32.totalorder %s786_s18, %s1318_s19 }
  0x7f   : > { %v1175_v33 = vld [vmem:[#allocation9 + $0x8] sm:$0xff]   ;;  %p1316_p9 = pneg %p1315_p7  ;;  %p1321_p11 = scmp.lt.s32.totalorder %s1319_s15, %s1313_s7 }
  0x80   : > { %v942_v35 = vld [vmem:[%s1750_s5] ss:$0 sm:$0xff] }
  0x81   : > { %996 = vmatpush3.bf16.msra.mxu0 %v1155_v3  ;;  %1016 = vmatpush3.bf16.msra.mxu1 %v1163_v8  ;;  %v951_v51 = vld [vmem:[%s1794_s14] ss:$0 sm:$0xff]  ;;  %p1322_p10 = por %p1321_p11, %p1320_p5 }
  0x82   : > { %997 = vmatprep.subr.bf16.mxu0 %v1418_v0  ;;  %1017 = vmatprep.subr.bf16.mxu1 %v1418_v0 }
  0x83   : > { %p1323_p3 = pnand %p1322_p10, %p1316_p9 }
  0x85   : > { %998 = vmatpush3.bf16.msra.mxu0 %v1156_v5  ;;  %1018 = vmatpush3.bf16.msra.mxu1 %v1164_v10 }
  0x86   : > { %999 = vmatprep.subr.bf16.mxu0 %v1418_v0  ;;  %1019 = vmatprep.subr.bf16.mxu1 %v1418_v0 }
  0x89   : > { %1000 = vmatpush3.bf16.msra.mxu0 %v1157_v7  ;;  %1020 = vmatpush3.bf16.msra.mxu1 %v1165_v12 }
  0x8a   : > { %1001 = vmatprep.subr.bf16.mxu0 %v1418_v0  ;;  %1021 = vmatprep.subr.bf16.mxu1 %v1418_v0 }
  0x8d   : > { %1002 = vmatpush3.bf16.msra.mxu0 %v1158_v9  ;;  %1022 = vmatpush3.bf16.msra.mxu1 %v1166_v14 }
  0x8e   : > { %1003 = vmatprep.subr.bf16.mxu0 %v1418_v0  ;;  %1023 = vmatprep.subr.bf16.mxu1 %v1418_v0 }
  0x91   : > { %1004 = vmatpush3.bf16.msra.mxu0 %v1159_v11  ;;  %1024 = vmatpush3.bf16.msra.mxu1 %v1167_v16 }
  0x92   : > { %1005 = vmatprep.subr.bf16.mxu0 %v1418_v0  ;;  %1025 = vmatprep.subr.bf16.mxu1 %v1418_v0 }
  0x95   : > { %1006 = vmatpush3.bf16.msra.mxu0 %v1160_v13  ;;  %1026 = vmatpush3.bf16.msra.mxu1 %v1168_v17 }
  0x96   : > { %1031 = vmatprep.subr.bf16.mxu0 %v1418_v0 }
  0x98   : > { %1008 = vmatmul.mubr.bf16.vlgmr.msra.gmra.mxu0 %v420_v15 }
  0x99   : > { %1047 = vmatprep.mubr.msk.bf16.mxu0 %vm1419_vm0, %v1418_v0  ;;  %1032 = vmatpush3.bf16.msra.mxu0 %v1169_v27 }
  0x9a   : > { %1033 = vmatprep.subr.bf16.mxu0 %v1418_v0 }
  0x9d   : > { %1034 = vmatpush3.bf16.msra.mxu0 %v1170_v28 }
  0x9e   : > { %1035 = vmatprep.subr.bf16.mxu0 %v1418_v0 }
  0xa1   : > { %1036 = vmatpush3.bf16.msra.mxu0 %v1171_v29 }
  0xa2   : > { %1037 = vmatprep.subr.bf16.mxu0 %v1418_v0 }
  0xa5   : > { %1038 = vmatpush3.bf16.msra.mxu0 %v1172_v30 }
  0xa6   : > { %1039 = vmatprep.subr.bf16.mxu0 %v1418_v0 }
  0xa9   : > { %1040 = vmatpush3.bf16.msra.mxu0 %v1173_v31 }
  0xaa   : > { %1041 = vmatprep.subr.bf16.mxu0 %v1418_v0 }
  0xad   : > { %1042 = vmatpush3.bf16.msra.mxu0 %v1174_v32 }
  0xae   : > { %1043 = vmatprep.subr.bf16.mxu0 %v1418_v0 }
  0xb1   : > { %1044 = vmatpush3.bf16.msra.mxu0 %v1175_v33 }
  0xb2   : > { %1045 = vmatprep.subr.bf16.mxu0 %v1418_v0 }
  0xb5   : > { %1046 = vmatpush3.bf16.msra.mxu0 %v1176_v34 }
 0x158   : > { %v526_v19 = vpop.f32.mrf.mxu0 }
 0x159   : > { %v527_v21 = vadd.f32 %v933_v18, %v526_v19 }
 0x15a   : > { %v1009_v22 = vpop.f32.mrf.mxu0 }
 0x15b   : > { %v533_v23 = vadd.f32 %v532_v20, %v527_v21 }
 0x15c   : > { %v529_v24 = vpop.f32.mrf.mxu0 }
 0x15d   : > { %v534_v25 = vpack.c.bf16 %v533_v23, %v533_v23 }
 0x15e   : > { %v1010_v26 = vpop.f32.mrf.mxu0 }
 0x15f   : > { %1028 = vmatmul.mubr.bf16.vlgmr.msra.gmra.mxu1 %v534_v25 }
 0x21f   : > { %v640_v36 = vpop.f32.mrf.mxu1 }
 0x220   : > { %v641_v37 = vadd.f32 %v942_v35, %v640_v36 }
 0x221   : > { %v1029_v38 = vpop.f32.mrf.mxu1 }
 0x222   : > { %v646_v39 = vmul.f32 %v641_v37, %v641_v37 }
 0x223   : > { %v643_v40 = vpop.f32.mrf.mxu1 }
 0x224   : > { %v647_v41 = vmul.f32 %v646_v39, %v641_v37 }
 0x225   : > { %v1030_v42 = vpop.f32.mrf.mxu1 }
 0x226   : > { %v648_v43 = vmul.f32 0.044715, %v647_v41 }
 0x228   : > { %v649_v44 = vadd.f32 %v648_v43, %v641_v37 }
 0x22a   : > { %v650_v45 = vmul.f32 0.7978846, %v649_v44 }
 0x22c   : > { %1177 = vtanh.f32 %v650_v45 }
 0x239   : > { %v1178_v46 = vpop.eup %1177 }
 0x23a   : > { %v652_v47 = vadd.f32 1.0, %v1178_v46 }
 0x23c   : > { %v653_v48 = vmul.f32 0.5, %v652_v47 }
 0x23e   : > { %v654_v49 = vmul.f32 %v653_v48, %v641_v37 }
 0x240   : > { %v655_v50 = vpack.c.bf16 %v654_v49, %v654_v49 }
 0x242   : > { %1048 = vmatmul.mubr.bf16.vlgmr.msra.gmra.mxu0 %v655_v50 }
 0x302   : > { %v761_v52 = vpop.f32.mrf.mxu0 }
 0x303   : > { %v762_v53 = vadd.f32 %v951_v51, %v761_v52 }
 0x304   : > { %v1049_v54 = vpop.f32.mrf.mxu0 }
 0x305   : > { %v767_v55 = vadd.f32 %v762_v53, %v533_v23 }
 0x306   : > { %v764_v56 = vpop.f32.mrf.mxu0 }
 0x307   : > { %v768_v57 = vpack.c.bf16 %v767_v55, %v767_v55 }
 0x308   : > { %v1050_v58 = vpop.f32.mrf.mxu0 }
 0x309   : > { %769 = vst [vmem:[%s418_s27] sm:$0xf] %v768_v57 }
 0x30a   : > { %1326 = shalt.err (!%p1323_p3)
}
 0x30b   : > { %s1327_s11 = scalar_lea.hbm %s1703_s0, 64  ;;  %s1331_s25 = scalar_lea.hbm %s1795_s16, 128 }
 0x30c   : > { %p1328_p8 = scmp.ne.s32.totalorder %s1703_s0, %s1327_s11  ;;  %p1332_p0 = scmp.lt.s32.totalorder %s1703_s0, %s1795_s16 }
 0x30d   : > { %p1333_p13 = scmp.lt.s32.totalorder %s1331_s25, %s1327_s11 }
 0x30e   : > { %p1329_p2 = pnand %p1328_p8, %p1796_p12 }
 0x30f   : > { %p1334_p1 = por %p1333_p13, %p1332_p0 }
 0x310   : > { %p1330_p6 = pneg %p1329_p2 }
 0x312   : > { %p1335_p4 = pnand %p1334_p1, %p1330_p6 }
 0x314   : > { %1338 = shalt.err (!%p1335_p4)
}
 0x315   : > { %1067 = dma.vmem_to_hbm [thread:$0]  (%p1796_p12), %s786_s18, 64, %s1703_s0, %s771_s8  }
 0x316 PF: > { %s1797_s24 = sld [smem:[#allocation18_spill]]  ;;  %p1800_p9 = scmp.ge.s32.totalorder %s1409_s10, 2 }
 0x317   : > { %s1798_s14 = sld [smem:[#allocation19_spill]] }
 0x31c   : > { %s797_s1 = sand.u32 1, %s1797_s24  }
 0x31d   : > { %p1799_p7 = scmp.ne.s32.totalorder %s1798_s14, 0  ;;  %s798_s27 = scalar_lea.sflag [#allocation4], %s797_s1 }
 0x31f   : > { %p1087_p5 = pnand %p1800_p9, %p1799_p7 }
 0x321   : > { %p1088_p11 = pneg %p1087_p5 }
 0x323   : > { %1384 = dma.done.wait (%p1088_p11), %s798_s27, 64  }
 0x324   : > { %1386 = vsyncadd (%p1088_p11), %s798_s27, 4294967232  ;;  %s26_s10 = sadd.s32 1, %s1409_s10   ;;  %s1801_s12 = sld [smem:[#allocation20_spill]] }
 0x325   : > { %p23_p10 = scmp.ge.s32.totalorder %s26_s10, 4   ;;  %s1802_s27 = smov %s1393_s28 }
 0x326   : > { %s1803_s28 = smov %s1397_s29  ;;  %s1804_s29 = smov %s1565_s23 }
 0x327   : > { %s1805_s30 = smov %s1405_s9  ;;  %25 = sbr.rel (!%p23_p10) target bundleno = 13 (0xd), region = 120 }
 0x32a   : > { %s1806_s9 = smov %s1801_s12 }
 0x32c   :  { %803 = vsyncpa [#allocation3], 1 }
 0x32d   :  { %805 = vsyncpa [#allocation3 + $0x1], 1 }
 0x32e   :  { %806 = vsyncpa [#allocation6], 1 }
 0x32f   :  { %807 = vsyncpa [#allocation10], 1 }
 0x330   :  { %808 = vsyncpa [#allocation4], 1 }
 0x331   :  { %810 = vsyncpa [#allocation4 + $0x1], 1 }

</bundles_post_ra>
